<compile_context>
chip_gen: v7x
topology: tpu7x:2x2x1
jax: 0.10.0
libtpu: 0.0.40
codegen_flags: <defaults>
</compile_context>

<pallas_src>
import functools
import math

import jax
import jax.numpy as jnp
from jax.experimental import pallas as pl
from jax.experimental.pallas import tpu as pltpu


def _round_up(x, m):
    return ((x + m - 1) // m) * m


def _c_gcn_kernel(d_ref, x_ref, theta_ref, bias_ref, o_ref, *, orders, activation):
    """One row tile.

    d_ref:     (ROWS, orders)     diag(T_k) replicated per row (precomputed)
    x_ref:     (ROWS, T)          input features for these rows
    theta_ref: (orders, T, H)     Theta1 reshaped (resident across grid steps)
    bias_ref:  (1, H)
    o_ref:     (ROWS, H)
    """
    x = x_ref[...].astype(jnp.float32)          # (ROWS, T)
    d = d_ref[...].astype(jnp.float32)          # (ROWS, orders)

    rows = x.shape[0]
    h = o_ref.shape[1]

    acc = jnp.zeros((rows, h), dtype=jnp.float32)
    for k in range(orders):                      # small static unroll
        scaled = x * d[:, k:k + 1]               # per-node diagonal scaling
        acc = acc + jnp.dot(scaled, theta_ref[k],
                            preferred_element_type=jnp.float32)

    acc = acc + bias_ref[...]                    # (1, H) broadcast

    if activation == 'relu':
        acc = jnp.maximum(acc, 0.0)
    elif activation == 'selu':
        acc = jax.nn.selu(acc)

    o_ref[...] = acc.astype(o_ref.dtype)


def c_gcn_forward(X, A_hat, theta1, bias, *, orders, activation='relu',
                  max_row_tile=512):
    """X: (B, N, T), A_hat: (N, N), theta1: (orders*T, H), bias: (H,)."""
    B, N, T = X.shape
    JT, H = theta1.shape
    assert JT == orders * T

    # ---- Precompute diag(T_k), k=0..orders-1, in plain JAX (depends only on A_hat).
    Ng = A_hat.shape[0]
    diags = [jnp.ones((Ng,), dtype=jnp.float32)]            # diag(T_0) = diag(I)
    if orders > 1:
        cheb_prev = jnp.eye(Ng, dtype=A_hat.dtype)
        cheb_cur = A_hat
        diags.append(jnp.diagonal(A_hat))                    # diag(T_1)
        for _k in range(2, orders):
            cheb_next = 2.0 * (A_hat @ cheb_cur) - cheb_prev
            diags.append(jnp.diagonal(cheb_next))
            cheb_prev, cheb_cur = cheb_cur, cheb_next
    D = jnp.stack(diags, axis=1).astype(X.dtype)              # (N, orders)

    # ---- Flatten batch x nodes into rows; replicate diag table over batch.
    rows = B * N
    x_flat = X.reshape(rows, T)
    d_rows = jnp.tile(D, (B, 1))                              # (B*N, orders)

    row_tile = min(max_row_tile, _round_up(rows, 8))
    padded = _round_up(rows, row_tile)
    if padded != rows:
        x_flat = jnp.pad(x_flat, ((0, padded - rows), (0, 0)))
        d_rows = jnp.pad(d_rows, ((0, padded - rows), (0, 0)))

    theta3 = theta1.reshape(orders, T, H)                     # theta3[k] == theta1[k*T:(k+1)*T]
    bias2 = bias.reshape(1, H)

    kernel = functools.partial(_c_gcn_kernel, orders=orders,
                               activation=activation)

    out_flat = pl.pallas_call(
        kernel,
        out_shape=jax.ShapeDtypeStruct((padded, H), X.dtype),
        grid=(padded // row_tile,),
        in_specs=[
            pl.BlockSpec((row_tile, orders), lambda i: (i, 0)),   # diag rows
            pl.BlockSpec((row_tile, T), lambda i: (i, 0)),        # X rows
            pl.BlockSpec((orders, T, H), lambda i: (0, 0, 0)),    # Theta1 (resident)
            pl.BlockSpec((1, H), lambda i: (0, 0)),               # bias (resident)
        ],
        out_specs=pl.BlockSpec((row_tile, H), lambda i: (i, 0)),
        compiler_params=pltpu.CompilerParams(
            dimension_semantics=("parallel",)),
    )(d_rows, x_flat, theta3, bias2)

    return out_flat[:rows].reshape(B, N, H)


def c_gcn_reference(X, A_hat, theta1, bias, *, orders, activation='relu'):
    """Pure-JAX transcription of the PyTorch forward, for verification."""
    N = A_hat.shape[0]
    cheb = [jnp.eye(N, dtype=A_hat.dtype)]
    for k in range(1, orders):
        if k == 1:
            cheb.append(A_hat)
        else:
            cheb.append(2.0 * (A_hat @ cheb[k - 1]) - cheb[k - 2])
    feats = [jnp.einsum('kk,bkj->bkj', cheb[k], X) for k in range(orders)]
    fc = jnp.concatenate(feats, axis=2)
    t2 = jnp.einsum('bkj,jh->bkh', fc, theta1) + bias
    if activation == 'relu':
        t2 = jax.nn.relu(t2)
    elif activation == 'selu':
        t2 = jax.nn.selu(t2)
    return t2


if __name__ == "__main__":
    # Small, deterministic problem: B=2 batches, N=16 nodes, T=8 timesteps
    # (= in_channels), H=32 output features, Chebyshev order 3.
    B, N, T, H, orders = 2, 16, 8, 32, 3

    key = jax.random.PRNGKey(0)
    kx, ka, kth, kb = jax.random.split(key, 4)

    X = jax.random.normal(kx, (B, N, T), dtype=jnp.float32)
    # A_hat: symmetric, scaled (stand-in for a normalized Laplacian).
    A = jax.random.normal(ka, (N, N), dtype=jnp.float32)
    A_hat = 0.5 * (A + A.T) / float(N)

    # Parameter init mirroring reset_parameters(): uniform(-stdv, stdv).
    stdv = 1.0 / math.sqrt(H)
    theta1 = jax.random.uniform(kth, (T * orders, H), dtype=jnp.float32,
                                minval=-stdv, maxval=stdv)
    stdv1 = 1.0 / math.sqrt(H)
    bias = jax.random.uniform(kb, (H,), dtype=jnp.float32,
                              minval=-stdv1, maxval=stdv1)

    ok = True
    for act in ('relu', 'selu'):
        out = c_gcn_forward(X, A_hat, theta1, bias, orders=orders,
                            activation=act)
        out = jax.block_until_ready(out)
        ref = c_gcn_reference(X, A_hat, theta1, bias, orders=orders,
                              activation=act)
        ref = jax.block_until_ready(ref)
        assert out.shape == (B, N, H), out.shape
        err = float(jnp.max(jnp.abs(out - ref)))
        if not jnp.allclose(out, ref, atol=1e-5, rtol=1e-5):
            ok = False
            print(f"mismatch vs reference ({act}): max abs err = {err}")

    if ok:
        print("KERNEL_OK")
</pallas_src>

<mosaic_0001>
module attributes {stable_mosaic.version = 11 : i64} {
  func.func @_c_gcn_kernel(%arg0: i32, %arg1: memref<32x3xf32, #tpu.memory_space<vmem>>, %arg2: memref<32x8xf32, #tpu.memory_space<vmem>>, %arg3: memref<3x8x32xf32, #tpu.memory_space<vmem>>, %arg4: memref<1x32xf32, #tpu.memory_space<vmem>>, %arg5: memref<32x32xf32, #tpu.memory_space<vmem>>) attributes {dimension_semantics = [#tpu.dimension_semantics<parallel>], iteration_bounds = array<i64: 1>, scalar_prefetch = 0 : i64, scratch_operands = 0 : i64, tpu.core_type = #tpu.core_type<tc>, window_params = [{transform_indices = @transform_0, window_bounds = array<i64: 32, 3>}, {transform_indices = @transform_1, window_bounds = array<i64: 32, 8>}, {pipeline_mode = #tpu.pipeline_mode<synchronous>, transform_indices = @transform_2, window_bounds = array<i64: 3, 8, 32>}, {pipeline_mode = #tpu.pipeline_mode<synchronous>, transform_indices = @transform_3, window_bounds = array<i64: 1, 32>}, {transform_indices = @transform_4, window_bounds = array<i64: 32, 32>}]} {
    %c0 = arith.constant 0 : index
    %c0_0 = arith.constant 0 : index
    %0 = vector.load %arg2[%c0, %c0_0] : memref<32x8xf32, #tpu.memory_space<vmem>>, vector<32x8xf32>
    %c0_1 = arith.constant 0 : index
    %c0_2 = arith.constant 0 : index
    %1 = vector.load %arg1[%c0_1, %c0_2] : memref<32x3xf32, #tpu.memory_space<vmem>>, vector<32x3xf32>
    %cst = arith.constant 0.000000e+00 : f32
    %2 = vector.broadcast %cst : f32 to vector<32x32xf32>
    %3 = vector.extract_strided_slice %1 {offsets = [0, 0], sizes = [32, 1], strides = [1, 1]} : vector<32x3xf32> to vector<32x1xf32>
    %4 = vector.broadcast %3 : vector<32x1xf32> to vector<32x8xf32>
    %5 = arith.mulf %0, %4 : vector<32x8xf32>
    %c0_3 = arith.constant 0 : index
    %c0_4 = arith.constant 0 : index
    %c0_5 = arith.constant 0 : index
    %6 = vector.load %arg3[%c0_3, %c0_4, %c0_5] : memref<3x8x32xf32, #tpu.memory_space<vmem>>, vector<1x8x32xf32>
    %7 = vector.shape_cast %6 : vector<1x8x32xf32> to vector<8x32xf32>
    %cst_6 = arith.constant dense<0.000000e+00> : vector<32x32xf32>
    %8 = tpu.matmul %5, %7, %cst_6 {dimension_numbers = #tpu.dot_dimension_numbers<[1], [0], [0], [1], [0, 0, 1, 1], [], []>} : vector<32x8xf32>, vector<8x32xf32>, vector<32x32xf32> -> vector<32x32xf32>
    %9 = arith.addf %2, %8 : vector<32x32xf32>
    %10 = vector.extract_strided_slice %1 {offsets = [0, 1], sizes = [32, 1], strides = [1, 1]} : vector<32x3xf32> to vector<32x1xf32>
    %11 = vector.broadcast %10 : vector<32x1xf32> to vector<32x8xf32>
    %12 = arith.mulf %0, %11 : vector<32x8xf32>
    %c1 = arith.constant 1 : index
    %c0_7 = arith.constant 0 : index
    %c0_8 = arith.constant 0 : index
    %13 = vector.load %arg3[%c1, %c0_7, %c0_8] : memref<3x8x32xf32, #tpu.memory_space<vmem>>, vector<1x8x32xf32>
    %14 = vector.shape_cast %13 : vector<1x8x32xf32> to vector<8x32xf32>
    %cst_9 = arith.constant dense<0.000000e+00> : vector<32x32xf32>
    %15 = tpu.matmul %12, %14, %cst_9 {dimension_numbers = #tpu.dot_dimension_numbers<[1], [0], [0], [1], [0, 0, 1, 1], [], []>} : vector<32x8xf32>, vector<8x32xf32>, vector<32x32xf32> -> vector<32x32xf32>
    %16 = arith.addf %9, %15 : vector<32x32xf32>
    %17 = vector.extract_strided_slice %1 {offsets = [0, 2], sizes = [32, 1], strides = [1, 1]} : vector<32x3xf32> to vector<32x1xf32>
    %18 = vector.broadcast %17 : vector<32x1xf32> to vector<32x8xf32>
    %19 = arith.mulf %0, %18 : vector<32x8xf32>
    %c2 = arith.constant 2 : index
    %c0_10 = arith.constant 0 : index
    %c0_11 = arith.constant 0 : index
    %20 = vector.load %arg3[%c2, %c0_10, %c0_11] : memref<3x8x32xf32, #tpu.memory_space<vmem>>, vector<1x8x32xf32>
    %21 = vector.shape_cast %20 : vector<1x8x32xf32> to vector<8x32xf32>
    %cst_12 = arith.constant dense<0.000000e+00> : vector<32x32xf32>
    %22 = tpu.matmul %19, %21, %cst_12 {dimension_numbers = #tpu.dot_dimension_numbers<[1], [0], [0], [1], [0, 0, 1, 1], [], []>} : vector<32x8xf32>, vector<8x32xf32>, vector<32x32xf32> -> vector<32x32xf32>
    %23 = arith.addf %16, %22 : vector<32x32xf32>
    %c0_13 = arith.constant 0 : index
    %c0_14 = arith.constant 0 : index
    %24 = vector.load %arg4[%c0_13, %c0_14] : memref<1x32xf32, #tpu.memory_space<vmem>>, vector<1x32xf32>
    %25 = vector.broadcast %24 : vector<1x32xf32> to vector<32x32xf32>
    %26 = arith.addf %23, %25 : vector<32x32xf32>
    %cst_15 = arith.constant 0.000000e+00 : f32
    %27 = vector.broadcast %cst_15 : f32 to vector<32x32xf32>
    %28 = arith.maximumf %26, %27 : vector<32x32xf32>
    %c0_16 = arith.constant 0 : index
    %c0_17 = arith.constant 0 : index
    %29 = vector.load %arg5[%c0_16, %c0_17] : memref<32x32xf32, #tpu.memory_space<vmem>>, vector<32x32xf32>
    tpu.vector_store %arg5[%c0_16, %c0_17], %28 {strides = array<i32>} : memref<32x32xf32, #tpu.memory_space<vmem>>, vector<32x32xf32>,
    return
  }
  func.func @transform_0(%arg0: i32) -> (i32, i32) {
    %c0_i32 = arith.constant 0 : i32
    %c0_i32_0 = arith.constant 0 : i32
    return %arg0, %c0_i32 : i32, i32
  }
  func.func @transform_1(%arg0: i32) -> (i32, i32) {
    %c0_i32 = arith.constant 0 : i32
    %c0_i32_0 = arith.constant 0 : i32
    return %arg0, %c0_i32 : i32, i32
  }
  func.func @transform_2(%arg0: i32) -> (i32, i32, i32) {
    %c0_i32 = arith.constant 0 : i32
    %c0_i32_0 = arith.constant 0 : i32
    %c0_i32_1 = arith.constant 0 : i32
    %c0_i32_2 = arith.constant 0 : i32
    return %c0_i32, %c0_i32_0, %c0_i32_1 : i32, i32, i32
  }
  func.func @transform_3(%arg0: i32) -> (i32, i32) {
    %c0_i32 = arith.constant 0 : i32
    %c0_i32_0 = arith.constant 0 : i32
    %c0_i32_1 = arith.constant 0 : i32
    return %c0_i32, %c0_i32_0 : i32, i32
  }
  func.func @transform_4(%arg0: i32) -> (i32, i32) {
    %c0_i32 = arith.constant 0 : i32
    %c0_i32_0 = arith.constant 0 : i32
    return %arg0, %c0_i32 : i32, i32
  }
}

</mosaic_0001>

<bundles_post_ra>
// kernel: tpu_custom_call.1
= control target key start
LH: loop header
LB: loop body
LE: loop exit
PB: predicated region body
PF: predicated region fallthrough
CT: control target
= control target key end

     0   :  { %v531_v2 = vmov 0   ;;  %s626_s0 = inlined_call_operand.vmem [shape: f32[32,3], index: 0, kind: input, shape index: {}]   ;;  %s627_s1 = inlined_call_operand.vmem [shape: f32[32,8], index: 1, kind: input, shape index: {}]   ;;  %s628_s2 = inlined_call_operand.vmem [shape: f32[3,8,32], index: 2, kind: input, shape index: {}]   ;;  %s629_s3 = inlined_call_operand.vmem [shape: f32[1,32], index: 3, kind: input, shape index: {}]   ;;  %s630_s4 = inlined_call_operand.hbm [shape: f32[32,32], index: 4, kind: output, shape index: {}]  }
   0x1   :  { %v23_v0 = vld [vmem:[%s626_s0 + $0x8] sm:$0xff]  ;;  %v22_v1 = vld [vmem:[%s626_s0] sm:$0xff]  ;;  %499 = vset.pattern.permute.xlu1 %v531_v2  ;;  %497 = vset.pattern.permute.xlu0 %v531_v2 }
   0x2   :  { %33 = vperm.xlu1 %499, %v23_v0   ;;  %28 = vperm.xlu0 %497, %v22_v1   ;;  %v50_v3 = vld [vmem:[%s628_s2] sm:$0xff] }
   0x3   :  { %9 = vsyncpa [#allocation3], 0  ;;  %465 = vmatprep.subr.mxu0 %v50_v3  ;;  %v532_v4 = vmov 1   ;;  %v427_v5 = vld [vmem:[%s628_s2 + $0x8] sm:$0xff]  ;;  %v24_v6 = vld [vmem:[%s626_s0 + $0x10] sm:$0xff]  ;;  %v533_v8 = vmov 2  }
   0x4   :  { %466 = vmatpush3.msra.mxu0 %v50_v3  ;;  %v25_v7 = vld [vmem:[%s626_s0 + $0x18] sm:$0xff]  ;;  %457 = vmatprep.subr.mxu1 %v427_v5  ;;  %v436_v9 = vld [vmem:[%s628_s2 + $0x10] sm:$0xff]  ;;  %v19_v10 = vld [vmem:[%s627_s1 + $0x8] sm:$0xff]  ;;  %vm73_vm0 = vcmask 64512   ;;  %vm406_vm1 = vcmask 261120   ;;  %s534_s10 = smov [#allocation2]  }
   0x5   :  { %458 = vmatpush3.msra.mxu1 %v427_v5  ;;  %473 = vmatprep.subr.mxu0 %v436_v9  ;;  %v18_v11 = vld [vmem:[%s627_s1] sm:$0xff]  ;;  %v20_v20 = vld [vmem:[%s627_s1 + $0x10] sm:$0xff]  ;;  %v21_v21 = vld [vmem:[%s627_s1 + $0x18] sm:$0xff] }
   0x6   :  { %500 = vset.pattern.permute.xlu1 %v532_v4  ;;  %498 = vset.pattern.permute.xlu0 %v532_v4  ;;  %v441_v41 = vld [vmem:[%s629_s3] ss:$0 sm:$0xff]  ;;  %s416_s3 = sshll.u32 %s534_s10, 4  ;;  %s417_s3 = int_to_ptr.vmem [resolvable:$true] %s416_s3 }
   0x7   :  { %56 = vperm.xlu1 %500, %v23_v0   ;;  %52 = vperm.xlu0 %498, %v22_v1   ;;  %s507_s11 = scalar_lea.vmem %s417_s3, 512  ;;  %p512_p1 = scmp.lt.s32.totalorder %s417_s3, %s417_s3 }
   0x8   :  { %481 = vmatprep.subr.mxu1 %v50_v3  ;;  %p508_p0 = scmp.ne.s32.totalorder %s417_s3, %s507_s11  ;;  %p513_p2 = scmp.lt.s32.totalorder %s507_s11, %s507_s11 }
   0xa   :  { %p514_p3 = por %p513_p2, %p512_p1 }
   0xb   :  { %60 = vperm.xlu1 %500, %v24_v6   ;;  %64 = vperm.xlu0 %498, %v25_v7  }
   0xc   :  { %p515_p4 = pnand %p514_p3, %p508_p0 }
   0xf   :  { %501 = vset.pattern.permute.xlu1 %v533_v8  ;;  %502 = vset.pattern.permute.xlu0 %v533_v8 }
  0x10   :  { %269 = vperm.xlu1 %501, %v22_v1   ;;  %273 = vperm.xlu0 %502, %v23_v0  }
  0x14   :  { %503 = vset.pattern.permute.xlu1 %v531_v2  ;;  %505 = vset.pattern.permute.xlu0 %v531_v2 }
  0x15   :  { %38 = vperm.xlu1 %503, %v24_v6   ;;  %43 = vperm.xlu0 %505, %v25_v7  }
  0x19   :  { %504 = vset.pattern.permute.xlu1 %v533_v8  ;;  %506 = vset.pattern.permute.xlu0 %v533_v8 }
  0x1a   :  { %277 = vperm.xlu1 %504, %v24_v6  }
  0x1e   :  { %281 = vperm.xlu1 %504, %v25_v7  }
  0x81   :  { %v34_v12 = vpop.permute.xlu1 %33  ;;  %v29_v13 = vpop.permute.xlu0 %28 }
  0x82   :  { %v47_v14 = vmul.f32 %v34_v12, %v19_v10  ;;  %v46_v15 = vmul.f32 %v29_v13, %v18_v11 }
  0x84   :  { %467 = vmatprep.mubr.msk.f32.mxu0 %vm73_vm0, %v46_v15 }
  0x85   :  { %468 = vmatmul.mubr.msk.f32.vlgmr.msra.gmra.mrb[0].mxu0 %vm73_vm0, %v47_v14 }
  0x86   :  { %v57_v16 = vpop.permute.xlu1 %56  ;;  %v53_v17 = vpop.permute.xlu0 %52  ;;  %474 = vmatpush3.msra.mxu0 %v436_v9 }
  0x87   :  { %v68_v18 = vmul.f32 %v57_v16, %v19_v10  ;;  %v67_v19 = vmul.f32 %v53_v17, %v18_v11 }
  0x89   :  { %459 = vmatprep.mubr.msk.f32.mxu1 %vm73_vm0, %v67_v19 }
  0x8a   :  { %v61_v22 = vpop.permute.xlu1 %60  ;;  %460 = vmatmul.mubr.msk.f32.vlgmr.msra.gmra.mrb[0].mxu1 %vm73_vm0, %v68_v18  ;;  %v65_v23 = vpop.permute.xlu0 %64 }
  0x8b   :  { %v69_v24 = vmul.f32 %v61_v22, %v20_v20  ;;  %v70_v25 = vmul.f32 %v65_v23, %v21_v21  ;;  %482 = vmatpush3.msra.mxu1 %v50_v3 }
  0x8d   :  { %462 = vmatprep.mubr.msk.f32.mxu1 %vm73_vm0, %v69_v24 }
  0x8e   :  { %463 = vmatmul.mubr.msk.f32.gmra.mrb[2].mxu1 %vm73_vm0, %v70_v25 }
  0x8f   :  { %v270_v26 = vpop.permute.xlu1 %269  ;;  %v274_v27 = vpop.permute.xlu0 %273 }
  0x90   :  { %v284_v28 = vmul.f32 %v270_v26, %v18_v11  ;;  %v285_v29 = vmul.f32 %v274_v27, %v19_v10 }
  0x92   :  { %475 = vmatprep.mubr.msk.f32.mxu0 %vm73_vm0, %v284_v28 }
  0x93   :  { %476 = vmatmul.mubr.msk.f32.vlgmr.msra.gmra.mrb[0].mxu0 %vm73_vm0, %v285_v29 }
  0x94   :  { %v39_v30 = vpop.permute.xlu1 %38  ;;  %v44_v31 = vpop.permute.xlu0 %43 }
  0x95   :  { %v48_v32 = vmul.f32 %v39_v30, %v20_v20  ;;  %v49_v33 = vmul.f32 %v44_v31, %v21_v21 }
  0x97   :  { %470 = vmatprep.mubr.msk.f32.mxu1 %vm73_vm0, %v48_v32 }
  0x98   :  { %471 = vmatmul.mubr.msk.f32.vlgmr.msra.gmra.mrb[2].mxu1 %vm73_vm0, %v49_v33 }
  0x99   :  { %v278_v34 = vpop.permute.xlu1 %277 }
  0x9a   :  { %v286_v35 = vmul.f32 %v278_v34, %v20_v20 }
  0x9c   :  { %478 = vmatprep.mubr.msk.f32.mxu0 %vm73_vm0, %v286_v35 }
  0x9d   :  { %v282_v36 = vpop.permute.xlu1 %281 }
  0x9e   :  { %v287_v37 = vmul.f32 %v282_v36, %v21_v21 }
  0xa0   :  { %479 = vmatmul.mubr.msk.f32.gmra.mrb[2].mxu0 %vm73_vm0, %v287_v37 }
 0x15d   :  { %v461_v38 = vpop.f32.mrb[0].mxu1 }
 0x15e   :  { %v152_v39 = vpop.f32.mrb[1].mxu1 }
 0x166   :  { %v477_v40 = vpop.f32.mrb[0].mxu0 }
 0x167   :  { %v483_v42 = vadd.f32 %v477_v40, %v461_v38  ;;  %v368_v43 = vpop.f32.mrb[1].mxu0 }
 0x168   :  { %v484_v44 = vadd.f32 %v368_v43, %v152_v39 }
 0x169   :  { %v399_v45 = vadd.f32 %v483_v42, %v441_v41 }
 0x16a   :  { %v398_v46 = vadd.f32 %v484_v44, %v441_v41 }
 0x16b   :  { %v403_v47 = vmax.f32 %v399_v45, 0.0  ;;  %v472_v48 = vpop.f32.mrb[2].mxu1 }
 0x16c   :  { %v402_v49 = vmax.f32 %v398_v46, 0.0  ;;  %v259_v50 = vpop.f32.mrb[3].mxu1 }
 0x16d   :  { %408 = vst.msk [vmem:[#allocation2 + $0x8] sm:$0xff] %vm406_vm1, %v403_v47 }
 0x16e   :  { %407 = vst.msk [vmem:[#allocation2] sm:$0xff] %vm406_vm1, %v402_v49 }
 0x173   :  { %v480_v51 = vpop.f32.mrb[2].mxu0 }
 0x174   :  { %v485_v52 = vadd.f32 %v480_v51, %v472_v48  ;;  %v378_v53 = vpop.f32.mrb[3].mxu0 }
 0x175   :  { %v486_v54 = vadd.f32 %v378_v53, %v259_v50 }
 0x176   :  { %v401_v55 = vadd.f32 %v485_v52, %v441_v41 }
 0x177   :  { %v400_v56 = vadd.f32 %v486_v54, %v441_v41 }
 0x178   :  { %v405_v57 = vmax.f32 %v401_v55, 0.0 }
 0x179   :  { %v404_v58 = vmax.f32 %v400_v56, 0.0 }
 0x17a   :  { %410 = vst.msk [vmem:[#allocation2 + $0x18] sm:$0xff] %vm406_vm1, %v405_v57 }
 0x17b   :  { %409 = vst.msk [vmem:[#allocation2 + $0x10] sm:$0xff] %vm406_vm1, %v404_v58 }
 0x17c   :  { %518 = shalt.err (!%p515_p4)
}
 0x17d   :  { %s519_s14 = scalar_lea.hbm %s630_s4, 512 }
 0x17e   :  { %p520_p5 = scmp.ne.s32.totalorder %s630_s4, %s519_s14  ;;  %p523_p6 = scmp.lt.u32.totalorder %s519_s14, %s630_s4 }
 0x180   :  { %p525_p7 = pnand %p523_p6, %p520_p5 }
 0x182   :  { %528 = shalt.err (!%p525_p7)
}
 0x183   :  { %s535_s19 = smov 128   ;;  %s536_s20 = smov 8  }
 0x184   :  { %422 = dma.vmem_to_hbm [thread:$0]  %s417_s3, 512, %s630_s4, [#allocation3], %s535_s19, %s535_s19, %s536_s20  }
 0x185   :  { %529 = dma.done.wait [#allocation3], 512  }
 0x186   :  { %530 = vsyncadd [#allocation3], 4294966784 }
 0x187   :  { %426 = vsyncpa [#allocation3], 1 }

</bundles_post_ra>
